<compile_context>
chip_gen: v7x
topology: tpu7x:2x2x1
jax: 0.10.0
libtpu: 0.0.40
codegen_flags: <defaults>
</compile_context>

<pallas_src>
import jax
import jax.numpy as jnp
from jax.experimental import pallas as pl
from jax.experimental.pallas import tpu as pltpu

H1, H2 = 256, 128      # hidden widths from the PyTorch module
LANE = 128             # TPU lane width
SUBLANE = 8            # TPU sublane width


def _round_up(x, m):
    return ((x + m - 1) // m) * m


def fastnn_kernel(x_ref, w1_ref, b1_ref, w2_ref, b2_ref, w3_ref, b3_ref, o_ref):
    # x_ref: (TB, s+a) bf16; w*: bf16 (in, out); b*: f32 (1, out); o_ref: f32.
    x = x_ref[...]
    h1 = jnp.tanh(
        jnp.dot(x, w1_ref[...], preferred_element_type=jnp.float32) + b1_ref[...]
    )
    h1 = h1.astype(jnp.bfloat16)                       # bf16 operands -> MXU fast path
    h2 = jnp.tanh(
        jnp.dot(h1, w2_ref[...], preferred_element_type=jnp.float32) + b2_ref[...]
    )
    h2 = h2.astype(jnp.bfloat16)
    o_ref[...] = jnp.tanh(
        jnp.dot(h2, w3_ref[...], preferred_element_type=jnp.float32) + b3_ref[...]
    )


def init_params(key, s_size, a_size):
    """PyTorch-equivalent Linear init; weights kept as (in, out) for y = x @ W + b."""
    dims = [(s_size + a_size, H1), (H1, H2), (H2, s_size)]
    params = {}
    keys = jax.random.split(key, 2 * len(dims))
    for i, (fan_in, fan_out) in enumerate(dims):
        bound = 1.0 / jnp.sqrt(jnp.float32(fan_in))
        params[f"w{i + 1}"] = jax.random.uniform(
            keys[2 * i], (fan_in, fan_out), minval=-bound, maxval=bound,
            dtype=jnp.float32)
        params[f"b{i + 1}"] = jax.random.uniform(
            keys[2 * i + 1], (1, fan_out), minval=-bound, maxval=bound,
            dtype=jnp.float32)
    return params


def prepare_params(params, s_size):
    """Cast weights to bf16 and zero-pad layer-3 outputs to a lane-dense width."""
    out_pad = _round_up(s_size, LANE)
    w3 = jnp.pad(params["w3"], ((0, 0), (0, out_pad - s_size)))
    b3 = jnp.pad(params["b3"], ((0, 0), (0, out_pad - s_size)))
    return {
        "w1": params["w1"].astype(jnp.bfloat16), "b1": params["b1"],
        "w2": params["w2"].astype(jnp.bfloat16), "b2": params["b2"],
        "w3": w3.astype(jnp.bfloat16),           "b3": b3,
    }


def fastnn_forward(sa, kparams, s_size, *, tb=256):
    """sa: (B, s+a) f32.  kparams: output of prepare_params.  Returns (B, s_size) f32."""
    B, in_dim = sa.shape
    out_pad = kparams["w3"].shape[1]

    # batch tile: multiple of 8 sublanes (256 default fills the MXU M-dim on v6e/v7x)
    tb = _round_up(min(tb, _round_up(B, SUBLANE)), SUBLANE)
    b_pad = _round_up(B, tb)
    if b_pad != B:
        sa = jnp.pad(sa, ((0, b_pad - B), (0, 0)))
    sa = sa.astype(jnp.bfloat16)
    nb = b_pad // tb

    def const_spec(arr):
        # constant block index across the batch grid -> DMA'd once, stays resident
        return pl.BlockSpec(arr.shape, lambda i, a=arr: (0,) * a.ndim)

    weight_bytes = sum(int(v.size) * v.dtype.itemsize for v in kparams.values())
    io_bytes = 2 * (tb * in_dim * 2 + tb * out_pad * 4)          # double-buffered tiles
    inter_bytes = tb * (H1 + H2) * (4 + 2)                       # f32 + bf16 intermediates
    vmem_limit = min(64 * 1024 * 1024,
                     max(4 * 1024 * 1024,
                         int(1.5 * (weight_bytes + io_bytes + inter_bytes))))

    flops = 2 * b_pad * (in_dim * H1 + H1 * H2 + H2 * out_pad)
    transcendentals = b_pad * (H1 + H2 + out_pad)
    bytes_accessed = int(sa.size * 2 + b_pad * out_pad * 4 + weight_bytes)

    out_padded = pl.pallas_call(
        fastnn_kernel,
        out_shape=jax.ShapeDtypeStruct((b_pad, out_pad), jnp.float32),
        grid=(nb,),
        in_specs=[
            pl.BlockSpec((tb, in_dim), lambda i: (i, 0)),
            const_spec(kparams["w1"]), const_spec(kparams["b1"]),
            const_spec(kparams["w2"]), const_spec(kparams["b2"]),
            const_spec(kparams["w3"]), const_spec(kparams["b3"]),
        ],
        out_specs=pl.BlockSpec((tb, out_pad), lambda i: (i, 0)),
        compiler_params=pltpu.CompilerParams(
            dimension_semantics=("parallel",),
            vmem_limit_bytes=vmem_limit,
        ),
        cost_estimate=pl.CostEstimate(
            flops=flops,
            transcendentals=transcendentals,
            bytes_accessed=bytes_accessed,
        ),
    )(sa, kparams["w1"], kparams["b1"], kparams["w2"], kparams["b2"],
      kparams["w3"], kparams["b3"])

    return out_padded[:B, :s_size]


def fastnn_reference(sa, params):
    """Pure-JAX reference mirroring the kernel's bf16-operand / f32-accum path."""
    x = sa
    for i in range(1, 4):
        w = params[f"w{i}"].astype(jnp.bfloat16)
        b = params[f"b{i}"]
        x = jnp.tanh(
            jnp.dot(x.astype(jnp.bfloat16), w, preferred_element_type=jnp.float32) + b
        )
    return x


if __name__ == "__main__":
    s_size, a_size = 16, 16
    batch = 8

    key = jax.random.PRNGKey(0)
    k_params, k_input = jax.random.split(key)

    params = init_params(k_params, s_size, a_size)
    kparams = prepare_params(params, s_size)
    sa = jax.random.normal(k_input, (batch, s_size + a_size), dtype=jnp.float32)

    out = fastnn_forward(sa, kparams, s_size)
    jax.block_until_ready(out)

    ref = fastnn_reference(sa, params)
    assert out.shape == (batch, s_size)
    assert jnp.allclose(out, ref, atol=1e-2), "mismatch vs reference"

    print("KERNEL_OK")
</pallas_src>

<mosaic_0001>
module attributes {stable_mosaic.version = 11 : i64} {
  func.func @fastnn_kernel(%arg0: i32, %arg1: memref<8x32xbf16, #tpu.memory_space<vmem>>, %arg2: memref<32x256xbf16, #tpu.memory_space<vmem>>, %arg3: memref<1x256xf32, #tpu.memory_space<vmem>>, %arg4: memref<256x128xbf16, #tpu.memory_space<vmem>>, %arg5: memref<1x128xf32, #tpu.memory_space<vmem>>, %arg6: memref<128x128xbf16, #tpu.memory_space<vmem>>, %arg7: memref<1x128xf32, #tpu.memory_space<vmem>>, %arg8: memref<8x128xf32, #tpu.memory_space<vmem>>) attributes {dimension_semantics = [#tpu.dimension_semantics<parallel>], iteration_bounds = array<i64: 1>, scalar_prefetch = 0 : i64, scratch_operands = 0 : i64, tpu.core_type = #tpu.core_type<tc>, window_params = [{transform_indices = @transform_0, window_bounds = array<i64: 8, 32>}, {pipeline_mode = #tpu.pipeline_mode<synchronous>, transform_indices = @transform_1, window_bounds = array<i64: 32, 256>}, {pipeline_mode = #tpu.pipeline_mode<synchronous>, transform_indices = @transform_2, window_bounds = array<i64: 1, 256>}, {pipeline_mode = #tpu.pipeline_mode<synchronous>, transform_indices = @transform_3, window_bounds = array<i64: 256, 128>}, {pipeline_mode = #tpu.pipeline_mode<synchronous>, transform_indices = @transform_4, window_bounds = array<i64: 1, 128>}, {pipeline_mode = #tpu.pipeline_mode<synchronous>, transform_indices = @transform_5, window_bounds = array<i64: 128, 128>}, {pipeline_mode = #tpu.pipeline_mode<synchronous>, transform_indices = @transform_6, window_bounds = array<i64: 1, 128>}, {transform_indices = @transform_7, window_bounds = array<i64: 8, 128>}]} {
    %c0 = arith.constant 0 : index
    %c0_0 = arith.constant 0 : index
    %0 = vector.load %arg1[%c0, %c0_0] : memref<8x32xbf16, #tpu.memory_space<vmem>>, vector<8x32xbf16>
    %c0_1 = arith.constant 0 : index
    %c0_2 = arith.constant 0 : index
    %1 = vector.load %arg2[%c0_1, %c0_2] : memref<32x256xbf16, #tpu.memory_space<vmem>>, vector<32x256xbf16>
    %cst = arith.constant dense<0.000000e+00> : vector<8x256xf32>
    %2 = tpu.matmul %0, %1, %cst {dimension_numbers = #tpu.dot_dimension_numbers<[1], [0], [0], [1], [0, 0, 1, 1], [], []>} : vector<8x32xbf16>, vector<32x256xbf16>, vector<8x256xf32> -> vector<8x256xf32>
    %c0_3 = arith.constant 0 : index
    %c0_4 = arith.constant 0 : index
    %3 = vector.load %arg3[%c0_3, %c0_4] : memref<1x256xf32, #tpu.memory_space<vmem>>, vector<1x256xf32>
    %4 = vector.broadcast %3 : vector<1x256xf32> to vector<8x256xf32>
    %5 = arith.addf %2, %4 : vector<8x256xf32>
    %6 = math.tanh %5 : vector<8x256xf32>
    %7 = arith.truncf %6 : vector<8x256xf32> to vector<8x256xbf16>
    %c0_5 = arith.constant 0 : index
    %c0_6 = arith.constant 0 : index
    %8 = vector.load %arg4[%c0_5, %c0_6] : memref<256x128xbf16, #tpu.memory_space<vmem>>, vector<256x128xbf16>
    %cst_7 = arith.constant dense<0.000000e+00> : vector<8x128xf32>
    %9 = tpu.matmul %7, %8, %cst_7 {dimension_numbers = #tpu.dot_dimension_numbers<[1], [0], [0], [1], [0, 0, 1, 1], [], []>} : vector<8x256xbf16>, vector<256x128xbf16>, vector<8x128xf32> -> vector<8x128xf32>
    %c0_8 = arith.constant 0 : index
    %c0_9 = arith.constant 0 : index
    %10 = vector.load %arg5[%c0_8, %c0_9] : memref<1x128xf32, #tpu.memory_space<vmem>>, vector<1x128xf32>
    %11 = vector.broadcast %10 : vector<1x128xf32> to vector<8x128xf32>
    %12 = arith.addf %9, %11 : vector<8x128xf32>
    %13 = math.tanh %12 : vector<8x128xf32>
    %14 = arith.truncf %13 : vector<8x128xf32> to vector<8x128xbf16>
    %c0_10 = arith.constant 0 : index
    %c0_11 = arith.constant 0 : index
    %15 = vector.load %arg6[%c0_10, %c0_11] : memref<128x128xbf16, #tpu.memory_space<vmem>>, vector<128x128xbf16>
    %cst_12 = arith.constant dense<0.000000e+00> : vector<8x128xf32>
    %16 = tpu.matmul %14, %15, %cst_12 {dimension_numbers = #tpu.dot_dimension_numbers<[1], [0], [0], [1], [0, 0, 1, 1], [], []>} : vector<8x128xbf16>, vector<128x128xbf16>, vector<8x128xf32> -> vector<8x128xf32>
    %c0_13 = arith.constant 0 : index
    %c0_14 = arith.constant 0 : index
    %17 = vector.load %arg7[%c0_13, %c0_14] : memref<1x128xf32, #tpu.memory_space<vmem>>, vector<1x128xf32>
    %18 = vector.broadcast %17 : vector<1x128xf32> to vector<8x128xf32>
    %19 = arith.addf %16, %18 : vector<8x128xf32>
    %20 = math.tanh %19 : vector<8x128xf32>
    %c0_15 = arith.constant 0 : index
    %c0_16 = arith.constant 0 : index
    %21 = vector.load %arg8[%c0_15, %c0_16] : memref<8x128xf32, #tpu.memory_space<vmem>>, vector<8x128xf32>
    tpu.vector_store %arg8[%c0_15, %c0_16], %20 {strides = array<i32>} : memref<8x128xf32, #tpu.memory_space<vmem>>, vector<8x128xf32>,
    return
  }
  func.func @transform_0(%arg0: i32) -> (i32, i32) {
    %c0_i32 = arith.constant 0 : i32
    %c0_i32_0 = arith.constant 0 : i32
    return %arg0, %c0_i32 : i32, i32
  }
  func.func @transform_1(%arg0: i32) -> (i32, i32) {
    %c0_i32 = arith.constant 0 : i32
    %c0_i32_0 = arith.constant 0 : i32
    %c0_i32_1 = arith.constant 0 : i32
    return %c0_i32, %c0_i32_0 : i32, i32
  }
  func.func @transform_2(%arg0: i32) -> (i32, i32) {
    %c0_i32 = arith.constant 0 : i32
    %c0_i32_0 = arith.constant 0 : i32
    %c0_i32_1 = arith.constant 0 : i32
    return %c0_i32, %c0_i32_0 : i32, i32
  }
  func.func @transform_3(%arg0: i32) -> (i32, i32) {
    %c0_i32 = arith.constant 0 : i32
    %c0_i32_0 = arith.constant 0 : i32
    %c0_i32_1 = arith.constant 0 : i32
    return %c0_i32, %c0_i32_0 : i32, i32
  }
  func.func @transform_4(%arg0: i32) -> (i32, i32) {
    %c0_i32 = arith.constant 0 : i32
    %c0_i32_0 = arith.constant 0 : i32
    %c0_i32_1 = arith.constant 0 : i32
    return %c0_i32, %c0_i32_0 : i32, i32
  }
  func.func @transform_5(%arg0: i32) -> (i32, i32) {
    %c0_i32 = arith.constant 0 : i32
    %c0_i32_0 = arith.constant 0 : i32
    %c0_i32_1 = arith.constant 0 : i32
    return %c0_i32, %c0_i32_0 : i32, i32
  }
  func.func @transform_6(%arg0: i32) -> (i32, i32) {
    %c0_i32 = arith.constant 0 : i32
    %c0_i32_0 = arith.constant 0 : i32
    %c0_i32_1 = arith.constant 0 : i32
    return %c0_i32, %c0_i32_0 : i32, i32
  }
  func.func @transform_7(%arg0: i32) -> (i32, i32) {
    %c0_i32 = arith.constant 0 : i32
    %c0_i32_0 = arith.constant 0 : i32
    return %arg0, %c0_i32 : i32, i32
  }
}

</mosaic_0001>

<bundles_post_ra>
// kernel: tpu_custom_call.1
= control target key start
LH: loop header
LB: loop body
LE: loop exit
PB: predicated region body
PF: predicated region fallthrough
CT: control target
= control target key end

     0   :  { %12 = vsyncpa [#allocation3], 0  ;;  %s845_s0 = inlined_call_operand.hbm [shape: bf16[8,32], index: 0, kind: input, shape index: {}]   ;;  %s846_s1 = inlined_call_operand.hbm [shape: bf16[32,256], index: 1, kind: input, shape index: {}]   ;;  %s847_s2 = inlined_call_operand.vmem [shape: f32[1,256], index: 2, kind: input, shape index: {}]   ;;  %s848_s3 = inlined_call_operand.hbm [shape: bf16[256,128], index: 3, kind: input, shape index: {}]   ;;  %s849_s4 = inlined_call_operand.vmem [shape: f32[1,128], index: 4, kind: input, shape index: {}]   ;;  %s850_s5 = inlined_call_operand.hbm [shape: bf16[128,128], index: 5, kind: input, shape index: {}]   ;;  %s851_s6 = inlined_call_operand.vmem [shape: f32[1,128], index: 6, kind: input, shape index: {}]   ;;  %s852_s7 = inlined_call_operand.hbm [shape: f32[8,128], index: 7, kind: output, shape index: {}]  }
   0x1   :  { %13 = vsyncpa [#allocation6], 0 }
   0x2   :  { %14 = vsyncpa [#allocation9], 0 }
   0x3   :  { %15 = vsyncpa [#allocation4], 0  ;;  %s724_s24 = smov [#allocation5]   ;;  %s606_s28 = scalar_lea.hbm %s846_s1, 512 }
   0x4   :  { %s31_s25 = sshll.u32 %s724_s24, 4  ;;  %p607_p0 = scmp.ne.s32.totalorder %s846_s1, %s606_s28  ;;  %s32_s25 = int_to_ptr.vmem [resolvable:$true] %s31_s25 }
   0x5   :  { %p610_p1 = scmp.lt.u32.totalorder %s606_s28, %s846_s1 }
   0x7   :  { %p612_p2 = pnand %p610_p1, %p607_p0 }
   0x9   :  { %615 = shalt.err (!%p612_p2)
}
   0xa   :  { %s616_s10 = scalar_lea.vmem %s32_s25, 512  ;;  %p621_p4 = scmp.lt.s32.totalorder %s32_s25, %s32_s25 }
   0xb   :  { %p617_p3 = scmp.ne.s32.totalorder %s32_s25, %s616_s10  ;;  %p622_p5 = scmp.lt.s32.totalorder %s616_s10, %s616_s10 }
   0xd   :  { %p623_p6 = por %p622_p5, %p621_p4 }
   0xf   :  { %p624_p7 = pnand %p623_p6, %p617_p3 }
  0x11   :  { %627 = shalt.err (!%p624_p7)
}
  0x12   :  { %s725_s11 = smov 128   ;;  %s726_s12 = smov 8  }
  0x13   :  { %37 = dma.hbm_to_vmem [thread:$0]  %s846_s1, 512, %s32_s25, [#allocation6], %s725_s11, %s725_s11, %s726_s12  }
  0x14   :  { %s727_s15 = smov [#allocation2]   ;;  %s728_s17 = smov [#allocation7]  }
  0x15   :  { %s22_s16 = sshll.u32 %s727_s15, 4  ;;  %s45_s18 = sshll.u32 %s728_s17, 4  ;;  %s23_s16 = int_to_ptr.vmem [resolvable:$true] %s22_s16  ;;  %s46_s18 = int_to_ptr.vmem [resolvable:$true] %s45_s18 }
  0x16   :  { %s628_s21 = scalar_lea.hbm %s845_s0, 64 }
  0x17   :  { %p629_p8 = scmp.ne.s32.totalorder %s845_s0, %s628_s21  ;;  %p632_p9 = scmp.lt.u32.totalorder %s628_s21, %s845_s0 }
  0x19   :  { %p634_p10 = pnand %p632_p9, %p629_p8 }
  0x1b   :  { %637 = shalt.err (!%p634_p10)
}
  0x1c   :  { %s638_s1 = scalar_lea.vmem %s23_s16, 64  ;;  %p643_p12 = scmp.lt.s32.totalorder %s23_s16, %s23_s16 }
  0x1d   :  { %p639_p11 = scmp.ne.s32.totalorder %s23_s16, %s638_s1  ;;  %p644_p13 = scmp.lt.s32.totalorder %s638_s1, %s638_s1 }
  0x1f   :  { %p645_p0 = por %p644_p13, %p643_p12 }
  0x21   :  { %p646_p1 = pnand %p645_p0, %p639_p11 }
  0x23   :  { %649 = shalt.err (!%p646_p1)
}
  0x24   :  { %25 = dma.hbm_to_vmem [thread:$0]  %s845_s0, 64, %s23_s16, [#allocation3]  }
  0x25   :  { %s650_s30 = scalar_lea.hbm %s848_s3, 2048 }
  0x26   :  { %p651_p2 = scmp.ne.s32.totalorder %s848_s3, %s650_s30  ;;  %p654_p3 = scmp.lt.u32.totalorder %s650_s30, %s848_s3 }
  0x28   :  { %p656_p4 = pnand %p654_p3, %p651_p2 }
  0x2a   :  { %659 = shalt.err (!%p656_p4)
}
  0x2b   :  { %s660_s12 = scalar_lea.vmem %s46_s18, 2048  ;;  %p665_p6 = scmp.lt.s32.totalorder %s46_s18, %s46_s18 }
  0x2c   :  { %p661_p5 = scmp.ne.s32.totalorder %s46_s18, %s660_s12  ;;  %p666_p7 = scmp.lt.s32.totalorder %s660_s12, %s660_s12 }
  0x2e   :  { %p667_p8 = por %p666_p7, %p665_p6 }
  0x30   :  { %p668_p9 = pnand %p667_p8, %p661_p5 }
  0x32   :  { %671 = shalt.err (!%p668_p9)
}
  0x33   :  { %s729_s0 = smov 64   ;;  %s730_s13 = smov 4  }
  0x34   :  { %51 = dma.hbm_to_vmem [thread:$0]  %s848_s3, 2048, %s46_s18, [#allocation6], %s729_s0, %s729_s0, %s730_s13  }
  0x35   :  { %s731_s16 = smov [#allocation8]   ;;  %s672_s21 = scalar_lea.hbm %s850_s5, 1024 }
  0x36   :  { %s59_s17 = sshll.u32 %s731_s16, 4  ;;  %p673_p10 = scmp.ne.s32.totalorder %s850_s5, %s672_s21  ;;  %s60_s17 = int_to_ptr.vmem [resolvable:$true] %s59_s17 }
  0x37   :  { %p676_p11 = scmp.lt.u32.totalorder %s672_s21, %s850_s5 }
  0x39   :  { %p678_p12 = pnand %p676_p11, %p673_p10 }
  0x3b   :  { %681 = shalt.err (!%p678_p12)
}
  0x3c   :  { %s682_s1 = scalar_lea.vmem %s60_s17, 1024  ;;  %p687_p0 = scmp.lt.s32.totalorder %s60_s17, %s60_s17 }
  0x3d   :  { %p683_p13 = scmp.ne.s32.totalorder %s60_s17, %s682_s1  ;;  %p688_p1 = scmp.lt.s32.totalorder %s682_s1, %s682_s1 }
  0x3f   :  { %p689_p2 = por %p688_p1, %p687_p0 }
  0x41   :  { %p690_p3 = pnand %p689_p2, %p683_p13 }
  0x43   :  { %693 = shalt.err (!%p690_p3)
}
  0x44   :  { %65 = dma.hbm_to_vmem [thread:$0]  %s850_s5, 1024, %s60_s17, [#allocation9], %s729_s0, %s729_s0, %s730_s13  }
  0x45   :  { %716 = dma.done.wait [#allocation3], 64  }
  0x46   :  { %717 = vsyncadd [#allocation3], 4294967232 }
  0x47   :  { %718 = dma.done.wait [#allocation6], 2560  }
  0x48   :  { %719 = vsyncadd [#allocation6], 4294964736 }
  0x49   :  { %720 = dma.done.wait [#allocation9], 1024  }
  0x4a   :  { %721 = vsyncadd [#allocation9], 4294966272  ;;  %v732_v0 = vmov 0   ;;  %v568_v1 = vld [vmem:[#allocation5 + $0x4] ss:$8 sps:$4 sm:$0xff]   ;;  %vm118_vm0 = vcmask 261120   ;;  %v88_v26 = vlaneseq }
  0x4b   :  { %154 = vmatprep.mubr.bf16.mxu0 %v732_v0  ;;  %v570_v2 = vld [vmem:[#allocation5] ss:$8 sps:$4 sm:$0xff]   ;;  %122 = vmatprep.subr.bf16.mxu0 %v568_v1  ;;  %v571_v3 = vld [vmem:[#allocation5 + $0x14] ss:$8 sps:$4 sm:$0xff]   ;;  %v573_v4 = vld [vmem:[#allocation5 + $0x10] ss:$8 sps:$4 sm:$0xff]  }
  0x4c   :  { %123 = vmatpush1.bf16.msra.mxu0 %v570_v2  ;;  %v574_v5 = vld [vmem:[#allocation7 + $0x40] sm:$0xff]   ;;  %v81_v7 = vld [vmem:[#allocation2] sm:$0xf]  ;;  %v576_v8 = vld [vmem:[#allocation7 + $0x48] sm:$0xff]   ;;  %v733_v23 = vmov 0.0   ;;  %v89_v27 = vshrl.u32 %v88_v26, 7 }
  0x4d   :  { %124 = vmatprep.subr.bf16.mxu0 %v571_v3  ;;  %v575_v6 = vld [vmem:[#allocation7] sm:$0xff]   ;;  %505 = vmatprep.subr.bf16.mxu1 %v574_v5  ;;  %v577_v9 = vld [vmem:[#allocation7 + $0x8] sm:$0xff]   ;;  %v578_v10 = vld [vmem:[#allocation7 + $0x50] sm:$0xff]   ;;  %vm734_vm1 = vmmov 0  }
  0x4e   :  { %506 = vmatpush3.bf16.msra.mxu1 %v575_v6  ;;  %v579_v11 = vld [vmem:[#allocation7 + $0x10] sm:$0xff]   ;;  %v580_v12 = vld [vmem:[#allocation7 + $0x58] sm:$0xff]   ;;  %v582_v14 = vld [vmem:[#allocation7 + $0x60] sm:$0xff]   ;;  %v90_v28 = vsub.s32 0, %v89_v27  ;;  %v94_v30 = vsub.s32 1, %v89_v27 }
  0x4f   :  { %507 = vmatprep.subr.bf16.mxu1 %v576_v8  ;;  %v581_v13 = vld [vmem:[#allocation7 + $0x18] sm:$0xff]   ;;  %v583_v15 = vld [vmem:[#allocation7 + $0x20] sm:$0xff]   ;;  %v584_v16 = vld [vmem:[#allocation7 + $0x68] sm:$0xff]  }
  0x50   :  { %125 = vmatpush1.bf16.msra.mxu0 %v573_v4  ;;  %v585_v17 = vld [vmem:[#allocation7 + $0x28] sm:$0xff]   ;;  %v586_v18 = vld [vmem:[#allocation7 + $0x70] sm:$0xff]   ;;  %v588_v20 = vld [vmem:[#allocation7 + $0x78] sm:$0xff]  }
  0x51   :  { %v587_v19 = vld [vmem:[#allocation7 + $0x30] sm:$0xff]   ;;  %v589_v21 = vld [vmem:[#allocation7 + $0x38] sm:$0xff]   ;;  %v590_v22 = vld [vmem:[#allocation8] sm:$0xff]   ;;  %536 = vmatprep.subr.bf16.mxu0 %v733_v23 }
  0x52   :  { %508 = vmatpush3.bf16.msra.mxu1 %v577_v9  ;;  %v591_v24 = vld [vmem:[#allocation8 + $0x8] sm:$0xff]   ;;  %v592_v25 = vld [vmem:[#allocation8 + $0x10] sm:$0xff]   ;;  %v86_v29 = vld [vmem:[%s847_s2] sm:$0x3] }
  0x53   :  { %478 = vmatmul.mubr.msk.bf16.vlgmr.msra.gmra.mrb[0].mxu0 %vm118_vm0, %v81_v7  ;;  %509 = vmatprep.subr.bf16.mxu1 %v578_v10  ;;  %v91_v31 = vrot.slane %v86_v29, %v90_v28  ;;  %v95_v32 = vrot.slane %v86_v29, %v94_v30  ;;  %v593_v43 = vld [vmem:[#allocation8 + $0x18] sm:$0xff]   ;;  %v594_v44 = vld [vmem:[#allocation8 + $0x20] sm:$0xff]   ;;  %v595_v45 = vld [vmem:[#allocation8 + $0x28] sm:$0xff]  }
  0x54   :  { %537 = vmatpush3.bf16.msra.mxu0 %v590_v22  ;;  %v596_v46 = vld [vmem:[#allocation8 + $0x30] sm:$0xff]   ;;  %v597_v47 = vld [vmem:[#allocation8 + $0x38] sm:$0xff]   ;;  %552 = vmatprep.mubr.msk.bf16.mxu0 %vm734_vm1, %v733_v23 }
  0x55   :  { %538 = vmatprep.subr.bf16.mxu0 %v733_v23  ;;  %v479_v49 = vld [vmem:[%s849_s4] ss:$0 sm:$0xff]  ;;  %s735_s4 = smov [#allocation10]  }
  0x56   :  { %510 = vmatpush3.bf16.msra.mxu1 %v579_v11  ;;  %v496_v57 = vld [vmem:[%s851_s6] ss:$0 sm:$0xff]  ;;  %s463_s30 = sshll.u32 %s735_s4, 4  ;;  %s464_s30 = int_to_ptr.vmem [resolvable:$true] %s463_s30 }
  0x57   :  { %511 = vmatprep.subr.bf16.mxu1 %v580_v12  ;;  %s694_s8 = scalar_lea.vmem %s464_s30, 128  ;;  %p699_p5 = scmp.lt.s32.totalorder %s464_s30, %s464_s30 }
  0x58   :  { %539 = vmatpush3.bf16.msra.mxu0 %v591_v24  ;;  %p695_p4 = scmp.ne.s32.totalorder %s464_s30, %s694_s8  ;;  %p700_p6 = scmp.lt.s32.totalorder %s694_s8, %s694_s8 }
  0x59   :  { %540 = vmatprep.subr.bf16.mxu0 %v733_v23 }
  0x5a   :  { %512 = vmatpush3.bf16.msra.mxu1 %v581_v13  ;;  %p701_p7 = por %p700_p6, %p699_p5 }
  0x5b   :  { %513 = vmatprep.subr.bf16.mxu1 %v582_v14 }
  0x5c   :  { %541 = vmatpush3.bf16.msra.mxu0 %v592_v25  ;;  %p702_p8 = pnand %p701_p7, %p695_p4 }
  0x5d   :  { %542 = vmatprep.subr.bf16.mxu0 %v733_v23 }
  0x5e   :  { %514 = vmatpush3.bf16.msra.mxu1 %v583_v15 }
  0x5f   :  { %515 = vmatprep.subr.bf16.mxu1 %v584_v16 }
  0x60   :  { %543 = vmatpush3.bf16.msra.mxu0 %v593_v43 }
  0x61   :  { %544 = vmatprep.subr.bf16.mxu0 %v733_v23 }
  0x62   :  { %516 = vmatpush3.bf16.msra.mxu1 %v585_v17 }
  0x63   :  { %517 = vmatprep.subr.bf16.mxu1 %v586_v18 }
  0x64   :  { %545 = vmatpush3.bf16.msra.mxu0 %v594_v44 }
  0x65   :  { %546 = vmatprep.subr.bf16.mxu0 %v733_v23 }
  0x66   :  { %518 = vmatpush3.bf16.msra.mxu1 %v587_v19 }
  0x67   :  { %519 = vmatprep.subr.bf16.mxu1 %v588_v20 }
  0x68   :  { %547 = vmatpush3.bf16.msra.mxu0 %v595_v45 }
  0x69   :  { %548 = vmatprep.subr.bf16.mxu0 %v733_v23 }
  0x6a   :  { %520 = vmatpush3.bf16.msra.mxu1 %v589_v21 }
  0x6c   :  { %549 = vmatpush3.bf16.msra.mxu0 %v596_v46 }
  0x6d   :  { %550 = vmatprep.subr.bf16.mxu0 %v733_v23 }
  0x70   :  { %551 = vmatpush3.bf16.msra.mxu0 %v597_v47 }
 0x126   :  { %v156_v33 = vpop.f32.mrb[0].mxu0 }
 0x127   :  { %v157_v34 = vadd.f32 %v156_v33, %v91_v31  ;;  %v158_v35 = vpop.f32.mrb[1].mxu0 }
 0x128   :  { %v159_v36 = vadd.f32 %v158_v35, %v95_v32  ;;  %v160_v37 = vpop.f32.mrb[2].mxu0 }
 0x129   :  { %598 = vtanh.f32 %v157_v34  ;;  %v161_v38 = vpop.f32.mrb[3].mxu0 }
 0x12a   :  { %600 = vtanh.f32 %v159_v36 }
 0x133   :  { %v599_v39 = vpop.eup %598 }
 0x134   :  { %v601_v40 = vpop.eup %600  ;;  %v165_v42 = vpack.c.bf16 %v599_v39, %v599_v39 }
 0x135   :  { %v166_v41 = vpack.c.bf16 %v601_v40, %v601_v40 }
 0x137   :  { %334 = vmatprep.mubr.bf16.mxu1 %v166_v41 }
 0x138   :  { %335 = vmatmul.mubr.bf16.vlgmr.msra.gmra.mrb[0].mxu1 %v165_v42 }
 0x20b   :  { %v521_v48 = vpop.f32.mrb[0].mxu1 }
 0x20c   :  { %v522_v50 = vpop.f32.mrb[1].mxu1 }
 0x20d   :  { %v523_v51 = vadd.f32 %v522_v50, %v521_v48  ;;  %v524_v52 = vpop.f32.mrb[2].mxu1 }
 0x20e   :  { %v525_v53 = vpop.f32.mrb[3].mxu1 }
 0x20f   :  { %v337_v54 = vadd.f32 %v523_v51, %v479_v49 }
 0x211   :  { %602 = vtanh.f32 %v337_v54 }
 0x21b   :  { %v603_v55 = vpop.eup %602 }
 0x21c   :  { %v343_v56 = vpack.c.bf16 %v603_v55, %v603_v55 }
 0x21e   :  { %553 = vmatmul.mubr.bf16.vlgmr.msra.gmra.mrb[4].mxu0 %v343_v56 }
 0x2f1   :  { %v449_v58 = vpop.f32.mrb[4].mxu0 }
 0x2f2   :  { %v450_v59 = vadd.f32 %v496_v57, %v449_v58  ;;  %v554_v60 = vpop.f32.mrb[5].mxu0 }
 0x2f3   :  { %v452_v61 = vpop.f32.mrb[6].mxu0 }
 0x2f4   :  { %604 = vtanh.f32 %v450_v59  ;;  %v555_v62 = vpop.f32.mrb[7].mxu0 }
 0x2fe   :  { %v605_v63 = vpop.eup %604 }
 0x2ff   :  { %456 = vst [vmem:[#allocation10] sm:$0xff] %v605_v63 }
 0x300   :  { %705 = shalt.err (!%p702_p8)
}
 0x301   :  { %s706_s10 = scalar_lea.hbm %s852_s7, 128 }
 0x302   :  { %p707_p9 = scmp.ne.s32.totalorder %s852_s7, %s706_s10  ;;  %p710_p10 = scmp.lt.u32.totalorder %s706_s10, %s852_s7 }
 0x304   :  { %p712_p11 = pnand %p710_p10, %p707_p9 }
 0x306   :  { %715 = shalt.err (!%p712_p11)
}
 0x307   :  { %466 = dma.vmem_to_hbm [thread:$0]  %s464_s30, 128, %s852_s7, [#allocation4]  }
 0x308   :  { %722 = dma.done.wait [#allocation4], 128  }
 0x309   :  { %723 = vsyncadd [#allocation4], 4294967168 }
 0x30a   :  { %470 = vsyncpa [#allocation3], 1 }
 0x30b   :  { %471 = vsyncpa [#allocation6], 1 }
 0x30c   :  { %472 = vsyncpa [#allocation9], 1 }
 0x30d   :  { %473 = vsyncpa [#allocation4], 1 }

</bundles_post_ra>
